<compile_context>
chip_gen: v7x
topology: tpu7x:2x2x1
jax: 0.10.0
libtpu: 0.0.40
codegen_flags: <defaults>
</compile_context>

<pallas_src>
import jax
import jax.numpy as jnp
from jax.experimental import pallas as pl
from jax.experimental.pallas import tpu as pltpu


def last_layer_kernel(x_ref, w1_ref, b1_ref, w2_ref, b2_ref, enc_ref, out_ref):
    # encoder: h = relu(x @ W1 + b1)  -> (TB, 128), f32 accumulation on the MXU
    h = jnp.dot(x_ref[...].astype(jnp.bfloat16),
                w1_ref[...].astype(jnp.bfloat16),
                preferred_element_type=jnp.float32)
    h = jnp.maximum(h + b1_ref[...], 0.0)          # f32 epilogue
    enc_ref[...] = h.astype(enc_ref.dtype)         # == self.encoder_output
    # flatten is a no-op for (TB, 128); supervised head: y = h @ W2 + b2
    y = jnp.dot(h.astype(jnp.bfloat16),
                w2_ref[...].astype(jnp.bfloat16),
                preferred_element_type=jnp.float32)
    out_ref[...] = (y + b2_ref[...]).astype(out_ref.dtype)


def last_layer(x, w1_t, b1, w2_t, b2, *, block_rows=512):
    """x: (B, D_in) f32.  w1_t: (D_in, 128), b1: (1, 128),
    w2_t: (128, C), b2: (1, C).  Returns (encoder_output (B,128), logits (B,C))."""
    B, D_in = x.shape
    H = w1_t.shape[1]
    C = w2_t.shape[1]

    # Lane-dense logits: pad the head to a multiple of 128 output columns.
    C_pad = max(128, pl.cdiv(C, 128) * 128)
    if C_pad != C:
        w2_t = jnp.pad(w2_t, ((0, 0), (0, C_pad - C)))
        b2 = jnp.pad(b2, ((0, 0), (0, C_pad - C)))

    # Batch tiling: biggest tile up to block_rows, multiple of 8 sublanes.
    TB = min(block_rows, pl.cdiv(B, 8) * 8)
    B_pad = pl.cdiv(B, TB) * TB
    if B_pad != B:
        x = jnp.pad(x, ((0, B_pad - B), (0, 0)))

    enc_out, logits = pl.pallas_call(
        last_layer_kernel,
        out_shape=(jax.ShapeDtypeStruct((B_pad, H), jnp.float32),
                   jax.ShapeDtypeStruct((B_pad, C_pad), jnp.float32)),
        grid=(B_pad // TB,),
        in_specs=[
            pl.BlockSpec((TB, D_in), lambda i: (i, 0)),   # x, streamed per block
            pl.BlockSpec((D_in, H), lambda i: (0, 0)),    # W1, VMEM-resident
            pl.BlockSpec((1, H),    lambda i: (0, 0)),    # b1
            pl.BlockSpec((H, C_pad), lambda i: (0, 0)),   # W2 (lane-padded)
            pl.BlockSpec((1, C_pad), lambda i: (0, 0)),   # b2 (lane-padded)
        ],
        out_specs=(
            pl.BlockSpec((TB, H), lambda i: (i, 0)),      # encoder output
            pl.BlockSpec((TB, C_pad), lambda i: (i, 0)),  # logits slab
        ),
        compiler_params=pltpu.CompilerParams(
            dimension_semantics=("parallel",)),
    )(x, w1_t, b1, w2_t, b2)

    return enc_out[:B, :], logits[:B, :C]


if __name__ == "__main__":
    B, D_IN, H, C = 8, 256, 128, 2
    key = jax.random.PRNGKey(0)
    k_x, k_w1, k_b1, k_w2, k_b2 = jax.random.split(key, 5)

    x = jax.random.normal(k_x, (B, D_IN), dtype=jnp.float32)

    # Deterministic parameter init (PyTorch-style uniform fan-in bounds).
    bound1 = 1.0 / jnp.sqrt(D_IN)
    w1 = jax.random.uniform(k_w1, (H, D_IN), minval=-bound1, maxval=bound1,
                            dtype=jnp.float32)
    b1 = jax.random.uniform(k_b1, (1, H), minval=-bound1, maxval=bound1,
                            dtype=jnp.float32)
    bound2 = 1.0 / jnp.sqrt(H)
    w2 = jax.random.uniform(k_w2, (C, H), minval=-bound2, maxval=bound2,
                            dtype=jnp.float32)
    b2 = jax.random.uniform(k_b2, (1, C), minval=-bound2, maxval=bound2,
                            dtype=jnp.float32)

    # Kernel takes transposed weights (in, out).
    enc_out, logits = last_layer(x, w1.T, b1, w2.T, b2)
    jax.block_until_ready((enc_out, logits))

    # Pure-JAX f32 reference (kernel uses bf16 MXU inputs -> loose tolerance).
    h_ref = jnp.maximum(x @ w1.T + b1, 0.0)
    y_ref = h_ref @ w2.T + b2
    assert enc_out.shape == (B, H) and logits.shape == (B, C)
    assert jnp.allclose(enc_out, h_ref, atol=5e-2, rtol=5e-2)
    assert jnp.allclose(logits, y_ref, atol=5e-2, rtol=5e-2)

    print("KERNEL_OK")
</pallas_src>

<mosaic_0001>
module attributes {stable_mosaic.version = 11 : i64} {
  func.func @last_layer_kernel(%arg0: i32, %arg1: memref<8x256xf32, #tpu.memory_space<vmem>>, %arg2: memref<256x128xf32, #tpu.memory_space<vmem>>, %arg3: memref<1x128xf32, #tpu.memory_space<vmem>>, %arg4: memref<128x128xf32, #tpu.memory_space<vmem>>, %arg5: memref<1x128xf32, #tpu.memory_space<vmem>>, %arg6: memref<8x128xf32, #tpu.memory_space<vmem>>, %arg7: memref<8x128xf32, #tpu.memory_space<vmem>>) attributes {dimension_semantics = [#tpu.dimension_semantics<parallel>], iteration_bounds = array<i64: 1>, scalar_prefetch = 0 : i64, scratch_operands = 0 : i64, tpu.core_type = #tpu.core_type<tc>, window_params = [{transform_indices = @transform_0, window_bounds = array<i64: 8, 256>}, {pipeline_mode = #tpu.pipeline_mode<synchronous>, transform_indices = @transform_1, window_bounds = array<i64: 256, 128>}, {pipeline_mode = #tpu.pipeline_mode<synchronous>, transform_indices = @transform_2, window_bounds = array<i64: 1, 128>}, {pipeline_mode = #tpu.pipeline_mode<synchronous>, transform_indices = @transform_3, window_bounds = array<i64: 128, 128>}, {pipeline_mode = #tpu.pipeline_mode<synchronous>, transform_indices = @transform_4, window_bounds = array<i64: 1, 128>}, {transform_indices = @transform_5, window_bounds = array<i64: 8, 128>}, {transform_indices = @transform_6, window_bounds = array<i64: 8, 128>}]} {
    %c0 = arith.constant 0 : index
    %c0_0 = arith.constant 0 : index
    %0 = vector.load %arg1[%c0, %c0_0] : memref<8x256xf32, #tpu.memory_space<vmem>>, vector<8x256xf32>
    %1 = arith.truncf %0 : vector<8x256xf32> to vector<8x256xbf16>
    %c0_1 = arith.constant 0 : index
    %c0_2 = arith.constant 0 : index
    %2 = vector.load %arg2[%c0_1, %c0_2] : memref<256x128xf32, #tpu.memory_space<vmem>>, vector<256x128xf32>
    %3 = arith.truncf %2 : vector<256x128xf32> to vector<256x128xbf16>
    %cst = arith.constant dense<0.000000e+00> : vector<8x128xf32>
    %4 = tpu.matmul %1, %3, %cst {dimension_numbers = #tpu.dot_dimension_numbers<[1], [0], [0], [1], [0, 0, 1, 1], [], []>} : vector<8x256xbf16>, vector<256x128xbf16>, vector<8x128xf32> -> vector<8x128xf32>
    %c0_3 = arith.constant 0 : index
    %c0_4 = arith.constant 0 : index
    %5 = vector.load %arg3[%c0_3, %c0_4] : memref<1x128xf32, #tpu.memory_space<vmem>>, vector<1x128xf32>
    %6 = vector.broadcast %5 : vector<1x128xf32> to vector<8x128xf32>
    %7 = arith.addf %4, %6 : vector<8x128xf32>
    %cst_5 = arith.constant 0.000000e+00 : f32
    %8 = vector.broadcast %cst_5 : f32 to vector<8x128xf32>
    %9 = arith.maximumf %7, %8 : vector<8x128xf32>
    %c0_6 = arith.constant 0 : index
    %c0_7 = arith.constant 0 : index
    %10 = vector.load %arg6[%c0_6, %c0_7] : memref<8x128xf32, #tpu.memory_space<vmem>>, vector<8x128xf32>
    tpu.vector_store %arg6[%c0_6, %c0_7], %9 {strides = array<i32>} : memref<8x128xf32, #tpu.memory_space<vmem>>, vector<8x128xf32>,
    %11 = arith.truncf %9 : vector<8x128xf32> to vector<8x128xbf16>
    %c0_8 = arith.constant 0 : index
    %c0_9 = arith.constant 0 : index
    %12 = vector.load %arg4[%c0_8, %c0_9] : memref<128x128xf32, #tpu.memory_space<vmem>>, vector<128x128xf32>
    %13 = arith.truncf %12 : vector<128x128xf32> to vector<128x128xbf16>
    %cst_10 = arith.constant dense<0.000000e+00> : vector<8x128xf32>
    %14 = tpu.matmul %11, %13, %cst_10 {dimension_numbers = #tpu.dot_dimension_numbers<[1], [0], [0], [1], [0, 0, 1, 1], [], []>} : vector<8x128xbf16>, vector<128x128xbf16>, vector<8x128xf32> -> vector<8x128xf32>
    %c0_11 = arith.constant 0 : index
    %c0_12 = arith.constant 0 : index
    %15 = vector.load %arg5[%c0_11, %c0_12] : memref<1x128xf32, #tpu.memory_space<vmem>>, vector<1x128xf32>
    %16 = vector.broadcast %15 : vector<1x128xf32> to vector<8x128xf32>
    %17 = arith.addf %14, %16 : vector<8x128xf32>
    %c0_13 = arith.constant 0 : index
    %c0_14 = arith.constant 0 : index
    %18 = vector.load %arg7[%c0_13, %c0_14] : memref<8x128xf32, #tpu.memory_space<vmem>>, vector<8x128xf32>
    tpu.vector_store %arg7[%c0_13, %c0_14], %17 {strides = array<i32>} : memref<8x128xf32, #tpu.memory_space<vmem>>, vector<8x128xf32>,
    return
  }
  func.func @transform_0(%arg0: i32) -> (i32, i32) {
    %c0_i32 = arith.constant 0 : i32
    %c0_i32_0 = arith.constant 0 : i32
    return %arg0, %c0_i32 : i32, i32
  }
  func.func @transform_1(%arg0: i32) -> (i32, i32) {
    %c0_i32 = arith.constant 0 : i32
    %c0_i32_0 = arith.constant 0 : i32
    %c0_i32_1 = arith.constant 0 : i32
    return %c0_i32, %c0_i32_0 : i32, i32
  }
  func.func @transform_2(%arg0: i32) -> (i32, i32) {
    %c0_i32 = arith.constant 0 : i32
    %c0_i32_0 = arith.constant 0 : i32
    %c0_i32_1 = arith.constant 0 : i32
    return %c0_i32, %c0_i32_0 : i32, i32
  }
  func.func @transform_3(%arg0: i32) -> (i32, i32) {
    %c0_i32 = arith.constant 0 : i32
    %c0_i32_0 = arith.constant 0 : i32
    %c0_i32_1 = arith.constant 0 : i32
    return %c0_i32, %c0_i32_0 : i32, i32
  }
  func.func @transform_4(%arg0: i32) -> (i32, i32) {
    %c0_i32 = arith.constant 0 : i32
    %c0_i32_0 = arith.constant 0 : i32
    %c0_i32_1 = arith.constant 0 : i32
    return %c0_i32, %c0_i32_0 : i32, i32
  }
  func.func @transform_5(%arg0: i32) -> (i32, i32) {
    %c0_i32 = arith.constant 0 : i32
    %c0_i32_0 = arith.constant 0 : i32
    return %arg0, %c0_i32 : i32, i32
  }
  func.func @transform_6(%arg0: i32) -> (i32, i32) {
    %c0_i32 = arith.constant 0 : i32
    %c0_i32_0 = arith.constant 0 : i32
    return %arg0, %c0_i32 : i32, i32
  }
}

</mosaic_0001>

<bundles_post_ra>
// kernel: tpu_custom_call.1
= control target key start
LH: loop header
LB: loop body
LE: loop exit
PB: predicated region body
PF: predicated region fallthrough
CT: control target
= control target key end

     0   :  { %12 = vsyncpa [#allocation3], 0  ;;  %s573_s0 = inlined_call_operand.hbm [shape: f32[8,256], index: 0, kind: input, shape index: {}]   ;;  %s574_s1 = inlined_call_operand.hbm [shape: f32[256,128], index: 1, kind: input, shape index: {}]   ;;  %s575_s2 = inlined_call_operand.vmem [shape: f32[1,128], index: 2, kind: input, shape index: {}]   ;;  %s576_s3 = inlined_call_operand.hbm [shape: f32[128,128], index: 3, kind: input, shape index: {}]   ;;  %s577_s4 = inlined_call_operand.vmem [shape: f32[1,128], index: 4, kind: input, shape index: {}]   ;;  %s578_s5 = inlined_call_operand.hbm [shape: f32[8,128], index: 5, kind: output, shape index: {0}]   ;;  %s579_s6 = inlined_call_operand.hbm [shape: f32[8,128], index: 6, kind: output, shape index: {1}]  }
   0x1   :  { %13 = vsyncpa [#allocation6], 0 }
   0x2   :  { %14 = vsyncpa [#allocation4], 0 }
   0x3   :  { %15 = vsyncpa [#allocation10], 0  ;;  %s448_s21 = smov [#allocation5]   ;;  %s330_s25 = scalar_lea.hbm %s574_s1, 4096 }
   0x4   :  { %s31_s22 = sshll.u32 %s448_s21, 4  ;;  %p331_p0 = scmp.ne.s32.totalorder %s574_s1, %s330_s25  ;;  %s32_s22 = int_to_ptr.vmem [resolvable:$true] %s31_s22 }
   0x5   :  { %p334_p1 = scmp.lt.u32.totalorder %s330_s25, %s574_s1 }
   0x7   :  { %p336_p2 = pnand %p334_p1, %p331_p0 }
   0x9   :  { %339 = shalt.err (!%p336_p2)
}
   0xa   :  { %s340_s30 = scalar_lea.vmem %s32_s22, 4096  ;;  %p345_p4 = scmp.lt.s32.totalorder %s32_s22, %s32_s22 }
   0xb   :  { %p341_p3 = scmp.ne.s32.totalorder %s32_s22, %s340_s30  ;;  %p346_p5 = scmp.lt.s32.totalorder %s340_s30, %s340_s30 }
   0xd   :  { %p347_p6 = por %p346_p5, %p345_p4 }
   0xf   :  { %p348_p7 = pnand %p347_p6, %p341_p3 }
  0x11   :  { %351 = shalt.err (!%p348_p7)
}
  0x12   :  { %s449_s7 = smov 128   ;;  %s450_s8 = smov 8  }
  0x13   :  { %37 = dma.hbm_to_vmem [thread:$0]  %s574_s1, 4096, %s32_s22, [#allocation6], %s449_s7, %s449_s7, %s450_s8  }
  0x14   :  { %s451_s11 = smov [#allocation2]   ;;  %s452_s13 = smov [#allocation7]  }
  0x15   :  { %s22_s12 = sshll.u32 %s451_s11, 4  ;;  %s45_s14 = sshll.u32 %s452_s13, 4  ;;  %s23_s12 = int_to_ptr.vmem [resolvable:$true] %s22_s12  ;;  %s46_s14 = int_to_ptr.vmem [resolvable:$true] %s45_s14 }
  0x16   :  { %s352_s17 = scalar_lea.hbm %s573_s0, 256 }
  0x17   :  { %p353_p8 = scmp.ne.s32.totalorder %s573_s0, %s352_s17  ;;  %p356_p9 = scmp.lt.u32.totalorder %s352_s17, %s573_s0 }
  0x19   :  { %p358_p10 = pnand %p356_p9, %p353_p8 }
  0x1b   :  { %361 = shalt.err (!%p358_p10)
}
  0x1c   :  { %s362_s1 = scalar_lea.vmem %s23_s12, 256  ;;  %p367_p12 = scmp.lt.s32.totalorder %s23_s12, %s23_s12 }
  0x1d   :  { %p363_p11 = scmp.ne.s32.totalorder %s23_s12, %s362_s1  ;;  %p368_p13 = scmp.lt.s32.totalorder %s362_s1, %s362_s1 }
  0x1f   :  { %p369_p0 = por %p368_p13, %p367_p12 }
  0x21   :  { %p370_p1 = pnand %p369_p0, %p363_p11 }
  0x23   :  { %373 = shalt.err (!%p370_p1)
}
  0x24   :  { %25 = dma.hbm_to_vmem [thread:$0]  %s573_s0, 256, %s23_s12, [#allocation3]  }
  0x25   :  { %s374_s26 = scalar_lea.hbm %s576_s3, 2048 }
  0x26   :  { %p375_p2 = scmp.ne.s32.totalorder %s576_s3, %s374_s26  ;;  %p378_p3 = scmp.lt.u32.totalorder %s374_s26, %s576_s3 }
  0x28   :  { %p380_p4 = pnand %p378_p3, %p375_p2 }
  0x2a   :  { %383 = shalt.err (!%p380_p4)
}
  0x2b   :  { %s384_s9 = scalar_lea.vmem %s46_s14, 2048  ;;  %p389_p6 = scmp.lt.s32.totalorder %s46_s14, %s46_s14 }
  0x2c   :  { %p385_p5 = scmp.ne.s32.totalorder %s46_s14, %s384_s9  ;;  %p390_p7 = scmp.lt.s32.totalorder %s384_s9, %s384_s9 }
  0x2e   :  { %p391_p8 = por %p390_p7, %p389_p6 }
  0x30   :  { %p392_p9 = pnand %p391_p8, %p385_p5 }
  0x32   :  { %395 = shalt.err (!%p392_p9)
}
  0x33   :  { %51 = dma.hbm_to_vmem [thread:$0]  %s576_s3, 2048, %s46_s14, [#allocation6], %s449_s7, %s449_s7, %s450_s8  }
  0x34   :  { %440 = dma.done.wait [#allocation3], 256  }
  0x35   :  { %441 = vsyncadd [#allocation3], 4294967040 }
  0x36   :  { %442 = dma.done.wait [#allocation6], 6144  }
  0x37   :  { %443 = vsyncadd [#allocation6], 4294961152  ;;  %v453_v0 = vmov 0.0   ;;  %v84_v1 = vld [vmem:[#allocation5 + $0x80] sm:$0xff]  ;;  %v85_v2 = vld [vmem:[#allocation5 + $0x88] sm:$0xff]  ;;  %vm454_vm0 = vmmov 0  }
  0x38   :  { %301 = vmatprep.subr.bf16.mxu1 %v453_v0  ;;  %v68_v3 = vld [vmem:[#allocation5] sm:$0xff]  ;;  %v108_v4 = vpack.c.bf16 %v85_v2, %v84_v1  ;;  %v69_v5 = vld [vmem:[#allocation5 + $0x8] sm:$0xff]  ;;  %v86_v6 = vld [vmem:[#allocation5 + $0x90] sm:$0xff]  ;;  %317 = vmatprep.mubr.msk.bf16.mxu1 %vm454_vm0, %v453_v0  ;;  %s455_s8 = smov [#allocation8]  }
  0x39   :  { %v87_v7 = vld [vmem:[#allocation5 + $0x98] sm:$0xff]  ;;  %v100_v8 = vpack.c.bf16 %v69_v5, %v68_v3  ;;  %v70_v10 = vld [vmem:[#allocation5 + $0x10] sm:$0xff]  ;;  %v88_v12 = vld [vmem:[#allocation5 + $0xa0] sm:$0xff]  ;;  %s244_s11 = sshll.u32 %s455_s8, 4  ;;  %s245_s11 = int_to_ptr.vmem [resolvable:$true] %s244_s11 }
  0x3a   :  { %v109_v9 = vpack.c.bf16 %v87_v7, %v86_v6  ;;  %v71_v11 = vld [vmem:[#allocation5 + $0x18] sm:$0xff]  ;;  %270 = vmatprep.subr.bf16.mxu0 %v108_v4  ;;  %v89_v13 = vld [vmem:[#allocation5 + $0xa8] sm:$0xff]  ;;  %v72_v16 = vld [vmem:[#allocation5 + $0x20] sm:$0xff]  ;;  %s396_s12 = scalar_lea.vmem %s245_s11, 128  ;;  %p401_p11 = scmp.lt.s32.totalorder %s245_s11, %s245_s11 }
  0x3b   :  { %271 = vmatpush3.bf16.msra.mxu0 %v100_v8  ;;  %v101_v14 = vpack.c.bf16 %v71_v11, %v70_v10  ;;  %v110_v15 = vpack.c.bf16 %v89_v13, %v88_v12  ;;  %v73_v17 = vld [vmem:[#allocation5 + $0x28] sm:$0xff]  ;;  %v90_v18 = vld [vmem:[#allocation5 + $0xb0] sm:$0xff]  ;;  %v91_v19 = vld [vmem:[#allocation5 + $0xb8] sm:$0xff]  ;;  %p397_p10 = scmp.ne.s32.totalorder %s245_s11, %s396_s12  ;;  %p402_p12 = scmp.lt.s32.totalorder %s396_s12, %s396_s12 }
  0x3c   :  { %272 = vmatprep.subr.bf16.mxu0 %v109_v9  ;;  %v102_v20 = vpack.c.bf16 %v73_v17, %v72_v16  ;;  %v111_v21 = vpack.c.bf16 %v91_v19, %v90_v18  ;;  %v74_v22 = vld [vmem:[#allocation5 + $0x30] sm:$0xff]  ;;  %v75_v23 = vld [vmem:[#allocation5 + $0x38] sm:$0xff]  ;;  %v92_v24 = vld [vmem:[#allocation5 + $0xc0] sm:$0xff] }
  0x3d   :  { %v93_v25 = vld [vmem:[#allocation5 + $0xc8] sm:$0xff]  ;;  %v65_v26 = vld [vmem:[#allocation2 + $0x8] sm:$0xff]  ;;  %v166_v28 = vld [vmem:[#allocation7] sm:$0xff]  ;;  %v103_v30 = vpack.c.bf16 %v75_v23, %v74_v22  ;;  %p403_p13 = por %p402_p12, %p401_p11 }
  0x3e   :  { %v67_v27 = vpack.c.bf16 %v65_v26, %v65_v26  ;;  %v167_v29 = vld [vmem:[#allocation7 + $0x8] sm:$0xff]  ;;  %v168_v32 = vld [vmem:[#allocation7 + $0x10] sm:$0xff]  ;;  %v169_v33 = vld [vmem:[#allocation7 + $0x18] sm:$0xff]  ;;  %v112_v34 = vpack.c.bf16 %v93_v25, %v92_v24 }
  0x3f   :  { %273 = vmatpush3.bf16.msra.mxu0 %v101_v14  ;;  %v182_v31 = vpack.c.bf16 %v167_v29, %v166_v28  ;;  %v76_v35 = vld [vmem:[#allocation5 + $0x40] sm:$0xff]  ;;  %v77_v36 = vld [vmem:[#allocation5 + $0x48] sm:$0xff]  ;;  %v94_v37 = vld [vmem:[#allocation5 + $0xd0] sm:$0xff]  ;;  %v183_v39 = vpack.c.bf16 %v169_v33, %v168_v32  ;;  %p404_p0 = pnand %p403_p13, %p397_p10 }
  0x40   :  { %274 = vmatprep.subr.bf16.mxu0 %v110_v15  ;;  %155 = vmatprep.mubr.bf16.mxu0 %v67_v27  ;;  %v95_v38 = vld [vmem:[#allocation5 + $0xd8] sm:$0xff]  ;;  %v170_v40 = vld [vmem:[#allocation7 + $0x20] sm:$0xff]  ;;  %v171_v41 = vld [vmem:[#allocation7 + $0x28] sm:$0xff]  ;;  %v104_v42 = vpack.c.bf16 %v77_v36, %v76_v35 }
  0x41   :  { %302 = vmatpush3.bf16.msra.mxu1 %v182_v31  ;;  %v113_v43 = vpack.c.bf16 %v95_v38, %v94_v37  ;;  %v78_v44 = vld [vmem:[#allocation5 + $0x50] sm:$0xff]  ;;  %v79_v45 = vld [vmem:[#allocation5 + $0x58] sm:$0xff]  ;;  %v96_v46 = vld [vmem:[#allocation5 + $0xe0] sm:$0xff]  ;;  %v184_v48 = vpack.c.bf16 %v171_v41, %v170_v40 }
  0x42   :  { %303 = vmatprep.subr.bf16.mxu1 %v453_v0  ;;  %v97_v47 = vld [vmem:[#allocation5 + $0xe8] sm:$0xff]  ;;  %v172_v49 = vld [vmem:[#allocation7 + $0x30] sm:$0xff]  ;;  %v173_v50 = vld [vmem:[#allocation7 + $0x38] sm:$0xff]  ;;  %v105_v51 = vpack.c.bf16 %v79_v45, %v78_v44 }
  0x43   :  { %275 = vmatpush3.bf16.msra.mxu0 %v102_v20  ;;  %v114_v52 = vpack.c.bf16 %v97_v47, %v96_v46  ;;  %v80_v53 = vld [vmem:[#allocation5 + $0x60] sm:$0xff]  ;;  %v81_v54 = vld [vmem:[#allocation5 + $0x68] sm:$0xff]  ;;  %v98_v55 = vld [vmem:[#allocation5 + $0xf0] sm:$0xff]  ;;  %v185_v57 = vpack.c.bf16 %v173_v50, %v172_v49 }
  0x44   :  { %276 = vmatprep.subr.bf16.mxu0 %v111_v21  ;;  %v99_v56 = vld [vmem:[#allocation5 + $0xf8] sm:$0xff]  ;;  %v174_v58 = vld [vmem:[#allocation7 + $0x40] sm:$0xff]  ;;  %v175_v59 = vld [vmem:[#allocation7 + $0x48] sm:$0xff]  ;;  %v106_v60 = vpack.c.bf16 %v81_v54, %v80_v53 }
  0x45   :  { %304 = vmatpush3.bf16.msra.mxu1 %v183_v39  ;;  %v115_v61 = vpack.c.bf16 %v99_v56, %v98_v55  ;;  %v82_v62 = vld [vmem:[#allocation5 + $0x70] sm:$0xff]  ;;  %v83_v63 = vld [vmem:[#allocation5 + $0x78] sm:$0xff]  ;;  %v186_v1 = vpack.c.bf16 %v175_v59, %v174_v58  ;;  %v178_v8 = vld [vmem:[#allocation7 + $0x60] sm:$0xff] }
  0x46   :  { %305 = vmatprep.subr.bf16.mxu1 %v453_v0  ;;  %v176_v2 = vld [vmem:[#allocation7 + $0x50] sm:$0xff]  ;;  %v177_v3 = vld [vmem:[#allocation7 + $0x58] sm:$0xff]  ;;  %v107_v4 = vpack.c.bf16 %v83_v63, %v82_v62  ;;  %v179_v9 = vld [vmem:[#allocation7 + $0x68] sm:$0xff] }
  0x47   :  { %277 = vmatpush3.bf16.msra.mxu0 %v103_v30  ;;  %v64_v5 = vld [vmem:[#allocation2] sm:$0xff]  ;;  %v187_v6 = vpack.c.bf16 %v177_v3, %v176_v2  ;;  %v188_v10 = vpack.c.bf16 %v179_v9, %v178_v8  ;;  %v181_v12 = vld [vmem:[#allocation7 + $0x78] sm:$0xff] }
  0x48   :  { %278 = vmatprep.subr.bf16.mxu0 %v112_v34  ;;  %v66_v7 = vpack.c.bf16 %v64_v5, %v64_v5  ;;  %v180_v11 = vld [vmem:[#allocation7 + $0x70] sm:$0xff] }
  0x49   :  { %306 = vmatpush3.bf16.msra.mxu1 %v184_v48  ;;  %v189_v13 = vpack.c.bf16 %v181_v12, %v180_v11  ;;  %v268_v15 = vld [vmem:[%s575_s2] ss:$0 sm:$0xff] }
  0x4a   :  { %307 = vmatprep.subr.bf16.mxu1 %v453_v0 }
  0x4b   :  { %279 = vmatpush3.bf16.msra.mxu0 %v104_v42 }
  0x4c   :  { %280 = vmatprep.subr.bf16.mxu0 %v113_v43 }
  0x4d   :  { %308 = vmatpush3.bf16.msra.mxu1 %v185_v57 }
  0x4e   :  { %309 = vmatprep.subr.bf16.mxu1 %v453_v0 }
  0x4f   :  { %281 = vmatpush3.bf16.msra.mxu0 %v105_v51 }
  0x50   :  { %282 = vmatprep.subr.bf16.mxu0 %v114_v52 }
  0x51   :  { %310 = vmatpush3.bf16.msra.mxu1 %v186_v1 }
  0x52   :  { %311 = vmatprep.subr.bf16.mxu1 %v453_v0 }
  0x53   :  { %283 = vmatpush3.bf16.msra.mxu0 %v106_v60 }
  0x54   :  { %284 = vmatprep.subr.bf16.mxu0 %v115_v61 }
  0x55   :  { %312 = vmatpush3.bf16.msra.mxu1 %v187_v6 }
  0x56   :  { %313 = vmatprep.subr.bf16.mxu1 %v453_v0 }
  0x57   :  { %285 = vmatpush3.bf16.msra.mxu0 %v107_v4 }
  0x59   :  { %314 = vmatpush3.bf16.msra.mxu1 %v188_v10 }
  0x5a   :  { %156 = vmatmul.mubr.bf16.vlgmr.msra.gmra.mrb[0].mxu0 %v66_v7  ;;  %315 = vmatprep.subr.bf16.mxu1 %v453_v0 }
  0x5d   :  { %316 = vmatpush3.bf16.msra.mxu1 %v189_v13 }
 0x12d   :  { %v286_v14 = vpop.f32.mrb[0].mxu0 }
 0x12e   :  { %v287_v16 = vpop.f32.mrb[1].mxu0 }
 0x12f   :  { %v288_v17 = vadd.f32 %v287_v16, %v286_v14  ;;  %v289_v18 = vpop.f32.mrb[2].mxu0 }
 0x130   :  { %v290_v19 = vpop.f32.mrb[3].mxu0 }
 0x131   :  { %v158_v20 = vadd.f32 %v288_v17, %v268_v15 }
 0x133   :  { %v163_v21 = vmax.f32 %v158_v20, 0.0 }
 0x135   :  { %164 = vst [vmem:[#allocation8] sm:$0xff] %v163_v21  ;;  %v165_v22 = vpack.c.bf16 %v163_v21, %v163_v21 }
 0x137   :  { %318 = vmatmul.mubr.bf16.vlgmr.msra.gmra.mrb[0].mxu1 %v165_v22 }
 0x138   :  { %407 = shalt.err (!%p404_p0)
}
 0x139   :  { %s408_s14 = scalar_lea.hbm %s578_s5, 128 }
 0x13a   :  { %p409_p1 = scmp.ne.s32.totalorder %s578_s5, %s408_s14  ;;  %p412_p2 = scmp.lt.u32.totalorder %s408_s14, %s578_s5 }
 0x13c   :  { %p414_p3 = pnand %p412_p2, %p409_p1 }
 0x13e   :  { %417 = shalt.err (!%p414_p3)
}
 0x13f   :  { %247 = dma.vmem_to_hbm [thread:$0]  %s245_s11, 128, %s578_s5, [#allocation4]   ;;  %v269_v0 = vld [vmem:[%s577_s4] ss:$0 sm:$0xff] }
 0x140   :  { %s456_s22 = smov [#allocation9]  }
 0x141   :  { %s254_s23 = sshll.u32 %s456_s22, 4  ;;  %s255_s23 = int_to_ptr.vmem [resolvable:$true] %s254_s23 }
 0x142   :  { %s418_s24 = scalar_lea.vmem %s255_s23, 128  ;;  %p423_p5 = scmp.lt.s32.totalorder %s255_s23, %s255_s23 }
 0x143   :  { %p419_p4 = scmp.ne.s32.totalorder %s255_s23, %s418_s24  ;;  %p424_p6 = scmp.lt.s32.totalorder %s418_s24, %s418_s24 }
 0x145   :  { %p425_p7 = por %p424_p6, %p423_p5 }
 0x147   :  { %p426_p8 = pnand %p425_p7, %p419_p4 }
 0x20a   :  { %v231_v23 = vpop.f32.mrb[0].mxu1 }
 0x20b   :  { %v232_v24 = vadd.f32 %v269_v0, %v231_v23  ;;  %v319_v25 = vpop.f32.mrb[1].mxu1 }
 0x20c   :  { %v234_v26 = vpop.f32.mrb[2].mxu1 }
 0x20d   :  { %237 = vst [vmem:[#allocation9] sm:$0xff] %v232_v24  ;;  %v320_v27 = vpop.f32.mrb[3].mxu1 }
 0x20e   :  { %429 = shalt.err (!%p426_p8)
}
 0x20f   :  { %s430_s4 = scalar_lea.hbm %s579_s6, 128 }
 0x210   :  { %p431_p9 = scmp.ne.s32.totalorder %s579_s6, %s430_s4  ;;  %p434_p10 = scmp.lt.u32.totalorder %s430_s4, %s579_s6 }
 0x212   :  { %p436_p11 = pnand %p434_p10, %p431_p9 }
 0x214   :  { %439 = shalt.err (!%p436_p11)
}
 0x215   :  { %257 = dma.vmem_to_hbm [thread:$0]  %s255_s23, 128, %s579_s6, [#allocation10]  }
 0x216   :  { %444 = dma.done.wait [#allocation4], 128  }
 0x217   :  { %445 = vsyncadd [#allocation4], 4294967168 }
 0x218   :  { %446 = dma.done.wait [#allocation10], 128  }
 0x219   :  { %447 = vsyncadd [#allocation10], 4294967168 }
 0x21a   :  { %264 = vsyncpa [#allocation3], 1 }
 0x21b   :  { %265 = vsyncpa [#allocation6], 1 }
 0x21c   :  { %266 = vsyncpa [#allocation4], 1 }
 0x21d   :  { %267 = vsyncpa [#allocation10], 1 }

</bundles_post_ra>
